<compile_context>
chip_gen: v6e
topology: v6e:2x2x1
jax: 0.10.0
libtpu: 0.0.40
codegen_flags: <defaults>
</compile_context>

<pallas_src>
import functools

import jax
import jax.numpy as jnp
from jax.experimental import pallas as pl
from jax.experimental.pallas import tpu as pltpu


def _scaled_sub_kernel(org_ref, minus_ref, out_ref, *, gamma):
    # Pure VPU elementwise op; gamma is a trace-time Python float.
    out_ref[...] = (gamma * (org_ref[...] - minus_ref[...])).astype(out_ref.dtype)


_SMALL_BYTES = 1 * 1024 * 1024  # single-block fast-path threshold (per tensor)


def _chip_plan():
    """Returns (target_block_bytes_per_tensor, vmem_limit_bytes, min_grid_steps)."""
    try:
        vmem_cap = int(pltpu.get_tpu_info().vmem_capacity_bytes)
    except Exception:
        vmem_cap = 64 * 1024 * 1024  # unknown -> assume the tightest (v7x-like) budget
    if vmem_cap >= 128 * 1024 * 1024:
        # v5e / v6e: 128 MiB physical VMEM.
        # 8 MiB/tensor x 3 operands x 2 pipeline buffers = 48 MiB live.
        return 8 * 1024 * 1024, 64 * 1024 * 1024, 4
    # v7x: 64 MiB VMEM per TensorCore.
    # 4 MiB/tensor x 3 operands x 2 buffers = 24 MiB live; >= 4 steps per core.
    return 4 * 1024 * 1024, 40 * 1024 * 1024, 8


def _scaled_sub(org, minus, gamma):
    assert org.shape == minus.shape and org.dtype == minus.dtype
    dtype = org.dtype
    assert jnp.issubdtype(dtype, jnp.floating), (
        "MultipleOriginalLayer kernel expects floating-point inputs "
        "(integer inputs would promote to float in PyTorch).")
    orig_shape = org.shape
    itemsize = jnp.dtype(dtype).itemsize
    n = org.size
    # Per-dtype sublane minimum: 8 (f32), 16 (bf16), 32 (int8).
    sub_min = max(8, 32 // itemsize)

    kernel = functools.partial(_scaled_sub_kernel, gamma=float(gamma))
    target_block_bytes, vmem_limit, min_steps = _chip_plan()

    # ---------------- copy-free 2-D slab (rows, cols) ----------------
    cols = None
    for cand in (4096, 2048, 1024, 512, 256, 128):
        # Widest multiple-of-128 divisor that still keeps >= sub_min rows
        # (sublane-dense AND lane-dense, reshape is free).
        if n % cand == 0 and n // cand >= sub_min:
            cols = cand
            break
    if cols is None and n % 128 == 0:
        cols = 128  # lane-dense; too few rows to also be sublane-dense (tiny input)
    if cols is None and org.ndim >= 2:
        # Ragged element count: collapse leading dims, keep last dim at full
        # extent (satisfies the (8,128) rule with no pad/slice HBM passes).
        cols = orig_shape[-1]

    if cols is not None:
        rows = n // cols
        a2 = org.reshape(rows, cols)
        b2 = minus.reshape(rows, cols)
    else:
        # 1-D input whose length is not a multiple of 128: no copy-free 2-D view.
        rows, cols = 1, n
        a2 = org.reshape(1, n)
        b2 = minus.reshape(1, n)
        # TODO(synk): a 1-D ragged input too large for a single VMEM block would
        # need a pad+slice fallback; not expected for NCHW image tensors.

    padded_cols = pl.cdiv(cols, 128) * 128  # VMEM lane padding

    # ---------------- small / untileable inputs: one un-gridded block ----------------
    if n * itemsize <= _SMALL_BYTES or rows < 2 * sub_min:
        padded_rows = pl.cdiv(rows, sub_min) * sub_min
        needed = 3 * padded_rows * padded_cols * itemsize
        out2 = pl.pallas_call(
            kernel,
            out_shape=jax.ShapeDtypeStruct((rows, cols), dtype),
            compiler_params=pltpu.CompilerParams(
                vmem_limit_bytes=max(vmem_limit, needed + (1 << 20)),
            ),
        )(a2, b2)
        return out2.reshape(orig_shape)

    # ---------------- large inputs: 1-D "parallel" grid of big blocks ----------------
    row_bytes = padded_cols * itemsize  # VMEM bytes per row (lane-padded)

    # Rows per block from the per-generation byte budget, sublane-aligned.
    tgt_rows = max(sub_min, (target_block_bytes // row_bytes) // sub_min * sub_min)
    tgt_rows = min(tgt_rows, pl.cdiv(rows, sub_min) * sub_min)

    # Guarantee enough grid steps so input prefetch, compute, and output
    # write-back overlap; even step count so both v7x TensorCores stay balanced.
    steps = max(min_steps, pl.cdiv(rows, tgt_rows))
    if steps % 2:
        steps += 1
    block_rows = max(sub_min, pl.cdiv(pl.cdiv(rows, steps), sub_min) * sub_min)

    grid = (pl.cdiv(rows, block_rows),)  # partial last block handled by masking

    out2 = pl.pallas_call(
        kernel,
        out_shape=jax.ShapeDtypeStruct((rows, cols), dtype),
        grid=grid,
        in_specs=[
            pl.BlockSpec((block_rows, cols), lambda i: (i, 0)),
            pl.BlockSpec((block_rows, cols), lambda i: (i, 0)),
        ],
        out_specs=pl.BlockSpec((block_rows, cols), lambda i: (i, 0)),
        compiler_params=pltpu.CompilerParams(
            dimension_semantics=("parallel",),
            vmem_limit_bytes=vmem_limit,
        ),
        cost_estimate=pl.CostEstimate(
            flops=2 * n, transcendentals=0, bytes_accessed=3 * n * itemsize),
    )(a2, b2)

    return out2.reshape(orig_shape)


class MultipleOriginalLayer:
    """JAX/Pallas port of the PyTorch MultipleOriginalLayer module."""

    def __init__(self, gamma):
        self.gamma = float(gamma)

    def __call__(self, x):
        org_output = x['nnline_input']
        minus_output = x['nnline_output']
        x['multi_output'] = _scaled_sub(org_output, minus_output, self.gamma)
        return x


if __name__ == "__main__":
    key = jax.random.PRNGKey(0)
    keys = jax.random.split(key, 8)
    gamma = 0.5
    layer = MultipleOriginalLayer(gamma)

    # --- spec-sized input (small path, sublane-dense (8,256) single block) ---
    nnline_input = jax.random.normal(keys[0], (2, 4, 16, 16), dtype=jnp.float32)
    nnline_output = jax.random.normal(keys[1], (2, 4, 16, 16), dtype=jnp.float32)
    out_dict = layer({'nnline_input': nnline_input, 'nnline_output': nnline_output})
    result = jax.block_until_ready(out_dict['multi_output'])
    ref = gamma * (nnline_input - nnline_output)
    assert result.shape == (2, 4, 16, 16)
    assert jnp.allclose(result, ref, atol=1e-6), "small-path mismatch vs reference"

    # --- larger input (exercises the gridded, pipelined big-block path) ---
    big_in = jax.random.normal(keys[2], (2, 8, 128, 512), dtype=jnp.float32)
    big_out = jax.random.normal(keys[3], (2, 8, 128, 512), dtype=jnp.float32)
    out_dict2 = layer({'nnline_input': big_in, 'nnline_output': big_out})
    result2 = jax.block_until_ready(out_dict2['multi_output'])
    ref2 = gamma * (big_in - big_out)
    assert result2.shape == (2, 8, 128, 512)
    assert jnp.allclose(result2, ref2, atol=1e-6), "grid-path mismatch vs reference"

    # --- ragged small input (collapsed (rows, last_dim) single block, no padding copies) ---
    rg_in = jax.random.normal(keys[4], (2, 3, 17, 19), dtype=jnp.float32)
    rg_out = jax.random.normal(keys[5], (2, 3, 17, 19), dtype=jnp.float32)
    out_dict3 = layer({'nnline_input': rg_in, 'nnline_output': rg_out})
    result3 = jax.block_until_ready(out_dict3['multi_output'])
    ref3 = gamma * (rg_in - rg_out)
    assert result3.shape == (2, 3, 17, 19)
    assert jnp.allclose(result3, ref3, atol=1e-6), "ragged small-path mismatch vs reference"

    # --- ragged large input (gridded path with full-extent trailing dim) ---
    rl_in = jax.random.normal(keys[6], (2, 3, 179, 257), dtype=jnp.float32)
    rl_out = jax.random.normal(keys[7], (2, 3, 179, 257), dtype=jnp.float32)
    out_dict4 = layer({'nnline_input': rl_in, 'nnline_output': rl_out})
    result4 = jax.block_until_ready(out_dict4['multi_output'])
    ref4 = gamma * (rl_in - rl_out)
    assert result4.shape == (2, 3, 179, 257)
    assert jnp.allclose(result4, ref4, atol=1e-6), "ragged grid-path mismatch vs reference"

    print("KERNEL_OK")
</pallas_src>

<mosaic_0001>
module attributes {stable_mosaic.version = 11 : i64} {
  func.func @_scaled_sub_kernel(%arg0: memref<8x256xf32, #tpu.memory_space<vmem>>, %arg1: memref<8x256xf32, #tpu.memory_space<vmem>>, %arg2: memref<8x256xf32, #tpu.memory_space<vmem>>) attributes {dimension_semantics = [], scalar_prefetch = 0 : i64, scratch_operands = 0 : i64, tpu.core_type = #tpu.core_type<tc>} {
    %c0 = arith.constant 0 : index
    %c0_0 = arith.constant 0 : index
    %0 = vector.load %arg0[%c0, %c0_0] : memref<8x256xf32, #tpu.memory_space<vmem>>, vector<8x256xf32>
    %c0_1 = arith.constant 0 : index
    %c0_2 = arith.constant 0 : index
    %1 = vector.load %arg1[%c0_1, %c0_2] : memref<8x256xf32, #tpu.memory_space<vmem>>, vector<8x256xf32>
    %2 = arith.subf %0, %1 : vector<8x256xf32>
    %cst = arith.constant 5.000000e-01 : f32
    %3 = vector.broadcast %cst : f32 to vector<8x256xf32>
    %4 = arith.mulf %3, %2 : vector<8x256xf32>
    %c0_3 = arith.constant 0 : index
    %c0_4 = arith.constant 0 : index
    %5 = vector.load %arg2[%c0_3, %c0_4] : memref<8x256xf32, #tpu.memory_space<vmem>>, vector<8x256xf32>
    tpu.vector_store %arg2[%c0_3, %c0_4], %4 {strides = array<i32>} : memref<8x256xf32, #tpu.memory_space<vmem>>, vector<8x256xf32>,
    return
  }
}

</mosaic_0001>

<bundles_post_ra>
// kernel: tpu_custom_call.1
= control target key start
LH: loop header
LB: loop body
LE: loop exit
PB: predicated region body
PF: predicated region fallthrough
CT: control target
= control target key end

     0   :  { %7 = vsyncpa [#allocation3], 0  ;;  %s158_s0 = inlined_call_operand.hbm [shape: f32[8,256], index: 0, kind: input, shape index: {}]   ;;  %s159_s1 = inlined_call_operand.hbm [shape: f32[8,256], index: 1, kind: input, shape index: {}]   ;;  %s160_s2 = inlined_call_operand.hbm [shape: f32[8,256], index: 2, kind: output, shape index: {}]  }
   0x1   :  { %8 = vsyncpa [#allocation6], 0 }
   0x2   :  { %9 = vsyncpa [#allocation4], 0  ;;  %s131_s9 = smov [#allocation2]   ;;  %s132_s11 = smov [#allocation5]  }
   0x3   :  { %s16_s10 = sshll.u32 %s131_s9, 4  ;;  %s26_s12 = sshll.u32 %s132_s11, 4  ;;  %s17_s10 = int_to_ptr.vmem [resolvable:$true] %s16_s10  ;;  %s27_s12 = int_to_ptr.vmem [resolvable:$true] %s26_s12 }
   0x4   :  { %s73_s13 = scalar_lea.vmem %s17_s10, 256  ;;  %p78_p1 = scmp.lt.s32.totalorder %s17_s10, %s17_s10 }
   0x5   :  { %p74_p0 = scmp.ne.s32.totalorder %s17_s10, %s73_s13  ;;  %p79_p2 = scmp.lt.s32.totalorder %s73_s13, %s73_s13 }
   0x7   :  { %p80_p3 = por %p79_p2, %p78_p1 }
   0x9   :  { %p81_p4 = pnand %p80_p3, %p74_p0 }
   0xb   :  { %84 = shalt.err (!%p81_p4)
}
   0xc   :  { %19 = dma.hbm_to_vmem [thread:$0]  %s158_s0, 256, %s17_s10, [#allocation3]  }
   0xd   :  { %s93_s16 = scalar_lea.vmem %s27_s12, 256  ;;  %p98_p6 = scmp.lt.s32.totalorder %s27_s12, %s27_s12 }
   0xe   :  { %p94_p5 = scmp.ne.s32.totalorder %s27_s12, %s93_s16  ;;  %p99_p7 = scmp.lt.s32.totalorder %s93_s16, %s93_s16 }
  0x10   :  { %p100_p8 = por %p99_p7, %p98_p6 }
  0x12   :  { %p101_p9 = pnand %p100_p8, %p94_p5 }
  0x14   :  { %104 = shalt.err (!%p101_p9)
}
  0x15   :  { %29 = dma.hbm_to_vmem [thread:$0]  %s159_s1, 256, %s27_s12, [#allocation6]  }
  0x16   :  { %125 = dma.done.wait [#allocation3], 256  }
  0x17   :  { %126 = vsyncadd [#allocation3], 4294967040 }
  0x18   :  { %127 = dma.done.wait [#allocation6], 256  }
  0x19   :  { %128 = vsyncadd [#allocation6], 4294967040  ;;  %v36_v0 = vld [vmem:[#allocation2] sm:$0xff]  ;;  %v38_v1 = vld [vmem:[#allocation5] sm:$0xff]  ;;  %s133_s0 = smov [#allocation7]  }
  0x1a   :  { %v37_v2 = vld [vmem:[#allocation2 + $0x8] sm:$0xff]  ;;  %v40_v3 = vsub.f32 %v36_v0, %v38_v1  ;;  %v39_v4 = vld [vmem:[#allocation5 + $0x8] sm:$0xff]  ;;  %s52_s19 = sshll.u32 %s133_s0, 4  ;;  %s53_s19 = int_to_ptr.vmem [resolvable:$true] %s52_s19 }
  0x1b   :  { %v41_v5 = vsub.f32 %v37_v2, %v39_v4  ;;  %s105_s20 = scalar_lea.vmem %s53_s19, 256  ;;  %p110_p11 = scmp.lt.s32.totalorder %s53_s19, %s53_s19 }
  0x1c   :  { %v42_v6 = vmul.f32 0.5, %v40_v3  ;;  %p106_p10 = scmp.ne.s32.totalorder %s53_s19, %s105_s20  ;;  %p111_p12 = scmp.lt.s32.totalorder %s105_s20, %s105_s20 }
  0x1d   :  { %v43_v7 = vmul.f32 0.5, %v41_v5 }
  0x1e   :  { %44 = vst [vmem:[#allocation7] sm:$0xff] %v42_v6  ;;  %p112_p13 = por %p111_p12, %p110_p11 }
  0x1f   :  { %45 = vst [vmem:[#allocation7 + $0x8] sm:$0xff] %v43_v7 }
  0x20   :  { %p113_p0 = pnand %p112_p13, %p106_p10 }
  0x22   :  { %116 = shalt.err (!%p113_p0)
}
  0x23   :  { %55 = dma.vmem_to_hbm [thread:$0]  %s53_s19, 256, %s160_s2, [#allocation4]  }
  0x24   :  { %129 = dma.done.wait [#allocation4], 256  }
  0x25   :  { %130 = vsyncadd [#allocation4], 4294967040 }
  0x26   :  { %59 = vsyncpa [#allocation3], 1 }
  0x27   :  { %60 = vsyncpa [#allocation6], 1 }
  0x28   :  { %61 = vsyncpa [#allocation4], 1 }

</bundles_post_ra>
